<compile_context>
chip_gen: v7x
topology: tpu7x:2x2x1
jax: 0.10.0
libtpu: 0.0.40
codegen_flags: <defaults>
</compile_context>

<pallas_src>
import functools

import jax
import jax.numpy as jnp
from jax import lax
from jax.experimental import pallas as pl
from jax.experimental.pallas import tpu as pltpu


# ---------------------------------------------------------------------------
# One-time prep kernel: hard argmax one-hot mask for BOTH selectors at once.
# Weights of the two selectors are stacked as (2Y, X); output is (2Y, X) f32.
# Runs once per weight update, NOT in the per-inference hot path.
# ---------------------------------------------------------------------------
def hard_mask_kernel(w_ref, hard_ref):
    w = w_ref[...]                                          # (2Y, X) f32
    rows, cols = w.shape
    m = jnp.max(w, axis=1, keepdims=True)                   # row max (one-time XLU)
    col = lax.broadcasted_iota(jnp.int32, (rows, cols), 1)
    # first maximal column wins (matches torch.argmax first-occurrence pick);
    # w == m is safe exact-float compare because m is drawn from w itself.
    first_idx = jnp.min(jnp.where(w == m, col, cols), axis=1, keepdims=True)
    hard_ref[...] = (col == first_idx).astype(hard_ref.dtype)


@functools.partial(jax.jit, static_argnames=("lane_dense",))
def build_mask(w_a, w_b, lane_dense=False):
    """One-time (per weight update) mask prep.

    Returns the pre-summed, transposed mask (X, Y) in bf16 (values 0/1/2 are
    exact).  Cache the result and pass it to os_nor_apply(); do NOT rebuild it
    on every forward.

    lane_dense=True pads the mask columns (and hence the kernel output) to a
    multiple of 128 lanes: unmasked vst stores instead of vst.msk when Y < 128,
    at the cost of extra output HBM bytes + a wrapper-side slice.  Off by
    default for small Y where the x stream dominates.
    """
    y, xdim = w_a.shape
    w = jnp.concatenate([w_a, w_b], axis=0)                 # (2Y, X)
    # TODO(synk): tile this over X with a running max / first-index accumulator
    #             if in_features ever outgrows a single VMEM block (off hot path).
    hard = pl.pallas_call(
        hard_mask_kernel,
        out_shape=jax.ShapeDtypeStruct(w.shape, jnp.float32),
        in_specs=[pl.BlockSpec(w.shape, lambda: (0, 0))],
        out_specs=pl.BlockSpec(w.shape, lambda: (0, 0)),
    )(w)
    # Summed mask: mask_a + mask_b has values 0/1/2; the hot kernel then needs
    # only Y MXU columns and a single VPU min epilogue (no slice, no OR math).
    mask_sum_t = (hard[:y] + hard[y:]).T                    # (X, Y) f32, one-time transpose
    if lane_dense:
        yp = -(-y // 128) * 128
        mask_sum_t = jnp.pad(mask_sum_t, ((0, 0), (0, yp - y)))
    return mask_sum_t.astype(jnp.bfloat16)                  # bf16 exact for 0/1/2


# ---------------------------------------------------------------------------
# Hot kernel: one MXU call + one VPU min.  x and mask arrive already in the
# MXU dtype (no in-kernel cast -> no wasted HBM bytes on the dominant x stream).
# ---------------------------------------------------------------------------
def os_nor_kernel(x_ref, mask_ref, out_ref):
    acc = jnp.dot(x_ref[...], mask_ref[...],
                  preferred_element_type=jnp.float32)       # (TB, Y) f32, values 0/1/2
    # logical OR of the two selectors == clamp of the summed mask result.
    out_ref[...] = jnp.minimum(acc, 1.0).astype(out_ref.dtype)


def _round_up(v, m):
    return -(-v // m) * m


def _pick_block_b(b, xdim, ydim, x_bytes, cap=1024, budget=40 << 20):
    """Batch-tile size:
      * large tiles (512-1024) amortize the ~0.35us/grid-step overhead and get
        near-roofline HBM BW on v5e/v6e (128 MiB VMEM);
      * for medium/large batches that would otherwise fit one tile, force >= 2
        grid steps so dimension_semantics=("parallel",) can actually shard the
        axis across v7x's two TensorCores;
      * shrink until the double-buffered pipeline fits a v7x-safe VMEM budget
        (64 MiB physical there)."""
    if b <= cap:
        tb = b                                   # single full-extent tile
        if b >= 256:                             # split for v7x megacore
            tb = _round_up(_round_up(b, 2) // 2, 8)
    else:
        tb = cap

    def need(t):
        # 2x double-buffered x tile + single-buffered mask + 2x f32 out tile.
        return 2 * t * xdim * x_bytes + xdim * ydim * 2 + 2 * t * ydim * 4

    while tb > 8 and need(tb) > budget:
        tb = max(8, (tb // 2) // 8 * 8)          # keep sublane-multiple tiles
    return tb, need(tb)


def _vmem_limit(need_bytes):
    # Explicit limit with headroom: above the 16/32 MiB scoped defaults so big
    # batch tiles stay double-buffered, comfortably under v7x's 64 MiB physical.
    return int(min(max(2 * need_bytes, 32 << 20), 48 << 20))


def _pinned_mask_spec(xdim, ydim):
    idx = lambda i: (0, 0)
    buffered = getattr(pl, "Buffered", None)
    if buffered is not None:
        try:
            # Constant index map -> never re-fetched; single-buffering halves its
            # VMEM footprint (matters for large X under v7x's 64 MiB VMEM).
            return pl.BlockSpec((xdim, ydim), idx, pipeline_mode=buffered(1))
        except TypeError:
            pass
    return pl.BlockSpec((xdim, ydim), idx)


@functools.partial(jax.jit, static_argnames=("out_features", "block_b"))
def os_nor_apply(x, mask_t, out_features=None, block_b=None):
    """Hot path: call with a cached mask from build_mask().

    x must already be stored in the same (MXU) dtype as the mask — bf16 here —
    so no bytes are wasted on an in-kernel cast of the dominant HBM stream.
    """
    b, xdim = x.shape
    xm, yp = mask_t.shape
    assert xm == xdim, "mask / input feature mismatch"
    assert x.dtype == mask_t.dtype, (
        "store x upstream in the MXU dtype (e.g. bf16); no in-kernel casting")

    cap = block_b if block_b is not None else 1024
    tb, need = _pick_block_b(b, xdim, yp, jnp.dtype(x.dtype).itemsize, cap=cap)
    grid = (pl.cdiv(b, tb),)
    # NOTE: when b % tb != 0 the last tile computes on padded rows; this is safe
    # because Pallas masks out-of-range writes on the output block.
    out = pl.pallas_call(
        os_nor_kernel,
        out_shape=jax.ShapeDtypeStruct((b, yp), jnp.float32),
        grid=grid,
        in_specs=[
            pl.BlockSpec((tb, xdim), lambda i: (i, 0)),     # x tile over batch
            _pinned_mask_spec(xdim, yp),                    # pinned, single-buffered
        ],
        out_specs=pl.BlockSpec((tb, yp), lambda i: (i, 0)),
        compiler_params=pltpu.CompilerParams(
            dimension_semantics=("parallel",),              # shard batch across TCs (v7x)
            vmem_limit_bytes=_vmem_limit(need)),
    )(x, mask_t)
    if out_features is not None and out_features != yp:
        out = out[:, :out_features]                         # drop lane padding if any
    return out


def os_nor(x, w_a, w_b):
    """Convenience one-shot forward (mask prep + hot kernel).

    In a serving loop, call build_mask() once per weight update, cache the
    result, and call os_nor_apply(x, mask) directly — do not use this wrapper
    per inference.
    """
    mask_t = build_mask(w_a, w_b)
    return os_nor_apply(x.astype(mask_t.dtype), mask_t, out_features=w_a.shape[0])


if __name__ == "__main__":
    key = jax.random.PRNGKey(0)
    kx, ka, kb = jax.random.split(key, 3)

    B, X, Y = 8, 32, 16  # batch, in_features, out_features (OS_Nor(x=32, y=16))

    # Binary input, stored upstream in the MXU dtype (bf16 exact for 0/1 and
    # half the HBM bytes of f32).  Binary x is the module's documented contract.
    x = (jax.random.uniform(kx, (B, X)) > 0.5).astype(jnp.bfloat16)

    # Deterministic xavier_uniform_-style init for nn.Linear(X, Y).weight (Y, X).
    bound = (6.0 / (X + Y)) ** 0.5
    w_a = jax.random.uniform(ka, (Y, X), minval=-bound, maxval=bound, dtype=jnp.float32)
    w_b = jax.random.uniform(kb, (Y, X), minval=-bound, maxval=bound, dtype=jnp.float32)

    # One-time (per weight update) prep, cached; hot path is os_nor_apply only.
    mask_t = jax.block_until_ready(build_mask(w_a, w_b))
    out = jax.block_until_ready(os_nor_apply(x, mask_t, out_features=Y))

    # Pure-JAX reference (eval-mode straight-through mask == hard one-hot).
    def ref_onehot(w):
        return jax.nn.one_hot(jnp.argmax(w, axis=1), w.shape[1], dtype=jnp.float32)

    xf = x.astype(jnp.float32)
    oa = xf @ ref_onehot(w_a).T
    ob = xf @ ref_onehot(w_b).T
    ref = oa + ob - oa * ob

    # check_binary_tensor(out, 'nor') + reference match
    assert out.shape == (B, Y), f"bad output shape {out.shape}"
    assert bool(jnp.all((out == 0) | (out == 1))), "nor output contains non-binary values"
    assert bool(jnp.allclose(out, ref)), "kernel output does not match reference"

    print("KERNEL_OK")
</pallas_src>

<mosaic_0001>
module attributes {stable_mosaic.version = 11 : i64} {
  func.func @hard_mask_kernel(%arg0: memref<32x32xf32, #tpu.memory_space<vmem>>, %arg1: memref<32x32xf32, #tpu.memory_space<vmem>>) attributes {dimension_semantics = [], scalar_prefetch = 0 : i64, scratch_operands = 0 : i64, tpu.core_type = #tpu.core_type<tc>} {
    %c0 = arith.constant 0 : index
    %c0_0 = arith.constant 0 : index
    %0 = vector.load %arg0[%c0, %c0_0] : memref<32x32xf32, #tpu.memory_space<vmem>>, vector<32x32xf32>
    %cst = arith.constant dense<0xFF800000> : vector<32xf32>
    %1 = vector.multi_reduction <maximumf>, %0, %cst [1] : vector<32x32xf32> to vector<32xf32>
    %2 = vector.shape_cast %1 : vector<32xf32> to vector<32x1xf32>
    %3 = tpu.iota {dimensions = array<i32: 1>} : vector<32x32xi32>
    %4 = vector.broadcast %2 : vector<32x1xf32> to vector<32x32xf32>
    %5 = arith.cmpf oeq, %0, %4 : vector<32x32xf32>
    %c32_i32 = arith.constant 32 : i32
    %6 = vector.broadcast %c32_i32 : i32 to vector<32x32xi32>
    %7 = arith.select %5, %3, %6 : vector<32x32xi1>, vector<32x32xi32>
    %cst_1 = arith.constant dense<2147483647> : vector<32xi32>
    %8 = vector.multi_reduction <minsi>, %7, %cst_1 [1] : vector<32x32xi32> to vector<32xi32>
    %9 = vector.shape_cast %8 : vector<32xi32> to vector<32x1xi32>
    %10 = vector.broadcast %9 : vector<32x1xi32> to vector<32x32xi32>
    %11 = arith.cmpi eq, %3, %10 : vector<32x32xi32>
    %12 = arith.extui %11 : vector<32x32xi1> to vector<32x32xi32>
    %13 = arith.sitofp %12 : vector<32x32xi32> to vector<32x32xf32>
    %c0_2 = arith.constant 0 : index
    %c0_3 = arith.constant 0 : index
    %14 = vector.load %arg1[%c0_2, %c0_3] : memref<32x32xf32, #tpu.memory_space<vmem>>, vector<32x32xf32>
    tpu.vector_store %arg1[%c0_2, %c0_3], %13 {strides = array<i32>} : memref<32x32xf32, #tpu.memory_space<vmem>>, vector<32x32xf32>,
    return
  }
}

</mosaic_0001>

<bundles_post_ra>
// kernel: build_mask.1
= control target key start
LH: loop header
LB: loop body
LE: loop exit
PB: predicated region body
PF: predicated region fallthrough
CT: control target
= control target key end

     0   :  { %vm12_vm0 = vcmask 261120   ;;  %v25_v8 = vlaneseq  ;;  %v120_v60 = vmov 0.0   ;;  %s177_s0 = inlined_call_operand.vmem [shape: f32[32,32], index: 0, kind: input, shape index: {}]   ;;  %s178_s1 = inlined_call_operand.vmem [shape: f32[32,32], index: 1, kind: output, shape index: {}]  }
   0x1   :  { %v8_v0 = vld [vmem:[%s177_s0] sm:$0xff]  ;;  %v10_v1 = vld [vmem:[%s177_s0 + $0x10] sm:$0xff]  ;;  %v9_v2 = vld [vmem:[%s177_s0 + $0x8] sm:$0xff] }
   0x2   :  { %v13_v3 = vsel %vm12_vm0, %v8_v0, -inf  ;;  %v19_v4 = vsel %vm12_vm0, %v10_v1, -inf  ;;  %v11_v5 = vld [vmem:[%s177_s0 + $0x18] sm:$0xff]  ;;  %v16_v6 = vsel %vm12_vm0, %v9_v2, -inf  ;;  %v147_v9 = vand.u32 127, %v25_v8 }
   0x3   :  { %14 = vmax.xlane.f32.xlu0 %v13_v3  ;;  %20 = vmax.xlane.f32.xlu1 %v19_v4  ;;  %v22_v7 = vsel %vm12_vm0, %v11_v5, -inf }
   0x7   :  { %17 = vmax.xlane.f32.xlu0 %v16_v6  ;;  %23 = vmax.xlane.f32.xlu1 %v22_v7 }
  0x90   :  { %v15_v10 = vpop.xlane.xlu0 %14  ;;  %v21_v11 = vpop.xlane.xlu1 %20 }
  0x91   :  { %vm27_vm1 = vcmp.eq.f32.partialorder %v8_v0, %v15_v10  ;;  %vm29_vm2 = vcmp.eq.f32.partialorder %v10_v1, %v21_v11 }
  0x92   :  { %v31_v12 = vsel %vm27_vm1, %v147_v9, 32  ;;  %v33_v13 = vsel %vm29_vm2, %v147_v9, 32 }
  0x93   :  { %v35_v14 = vsel %vm12_vm0, %v31_v12, 2147483647  ;;  %v65_v15 = vsel %vm12_vm0, %v33_v13, 2147483647 }
  0x94   :  { %v18_v16 = vpop.xlane.xlu0 %17  ;;  %v24_v17 = vpop.xlane.xlu1 %23  ;;  %v37_v18 = vshra.s32 %v35_v14, 16  ;;  %v67_v19 = vshra.s32 %v65_v15, 16  ;;  %v36_v30 = vand.u32 65535, %v35_v14  ;;  %v66_v34 = vand.u32 65535, %v65_v15 }
  0x95   :  { %vm28_vm3 = vcmp.eq.f32.partialorder %v9_v2, %v18_v16  ;;  %vm30_vm4 = vcmp.eq.f32.partialorder %v11_v5, %v24_v17 }
  0x96   :  { %v32_v20 = vsel %vm28_vm3, %v147_v9, 32  ;;  %v34_v21 = vsel %vm30_vm4, %v147_v9, 32  ;;  %v39_v22 = vcvt.s32.f32 %v37_v18  ;;  %v69_v25 = vcvt.s32.f32 %v67_v19 }
  0x97   :  { %v50_v23 = vsel %vm12_vm0, %v32_v20, 2147483647  ;;  %v80_v24 = vsel %vm12_vm0, %v34_v21, 2147483647  ;;  %v38_v32 = vcvt.s32.f32 %v36_v30  ;;  %v68_v39 = vcvt.s32.f32 %v66_v34 }
  0x98   :  { %40 = vmin.xlane.f32.xlu0 %v39_v22  ;;  %v52_v26 = vshra.s32 %v50_v23, 16  ;;  %v82_v27 = vshra.s32 %v80_v24, 16  ;;  %v51_v33 = vand.u32 65535, %v50_v23  ;;  %v81_v40 = vand.u32 65535, %v80_v24 }
  0x9a   :  { %v54_v28 = vcvt.s32.f32 %v52_v26  ;;  %v84_v29 = vcvt.s32.f32 %v82_v27  ;;  %v53_v38 = vcvt.s32.f32 %v51_v33  ;;  %v83_v44 = vcvt.s32.f32 %v81_v40 }
  0x9c   :  { %70 = vmin.xlane.f32.xlu0 %v69_v25  ;;  %55 = vmin.xlane.f32.xlu1 %v54_v28 }
  0xa0   :  { %85 = vmin.xlane.f32.xlu1 %v84_v29 }
 0x125   :  { %v41_v31 = vpop.xlane.xlu0 %40 }
 0x126   :  { %vm42_vm5 = vcmp.eq.f32.partialorder %v39_v22, %v41_v31  ;;  %v47_v46 = vcvt.f32.s32 %v41_v31 }
 0x127   :  { %v43_v35 = vsel %vm42_vm5, %v38_v32, inf }
 0x128   :  { %44 = vmin.xlane.f32.xlu0 %v43_v35  ;;  %v48_v50 = vshll.u32 %v47_v46, 16 }
 0x129   :  { %v56_v36 = vpop.xlane.xlu1 %55  ;;  %v71_v37 = vpop.xlane.xlu0 %70 }
 0x12a   :  { %vm57_vm6 = vcmp.eq.f32.partialorder %v54_v28, %v56_v36  ;;  %vm72_vm7 = vcmp.eq.f32.partialorder %v69_v25, %v71_v37  ;;  %v62_v47 = vcvt.f32.s32 %v56_v36  ;;  %v77_v48 = vcvt.f32.s32 %v71_v37 }
 0x12b   :  { %v58_v41 = vsel %vm57_vm6, %v53_v38, inf  ;;  %v73_v42 = vsel %vm72_vm7, %v68_v39, inf }
 0x12c   :  { %59 = vmin.xlane.f32.xlu1 %v58_v41  ;;  %74 = vmin.xlane.f32.xlu0 %v73_v42  ;;  %v63_v53 = vshll.u32 %v62_v47, 16  ;;  %v78_v54 = vshll.u32 %v77_v48, 16 }
 0x12d   :  { %v86_v43 = vpop.xlane.xlu1 %85 }
 0x12e   :  { %vm87_vm8 = vcmp.eq.f32.partialorder %v84_v29, %v86_v43  ;;  %v92_v57 = vcvt.f32.s32 %v86_v43 }
 0x12f   :  { %v88_v45 = vsel %vm87_vm8, %v83_v44, inf }
 0x130   :  { %89 = vmin.xlane.f32.xlu1 %v88_v45  ;;  %v93_v1 = vshll.u32 %v92_v57, 16 }
 0x1b5   :  { %v45_v49 = vpop.xlane.xlu0 %44 }
 0x1b6   :  { %v46_v51 = vcvt.f32.s32 %v45_v49 }
 0x1b8   :  { %v49_v52 = vadd.s32 %v48_v50, %v46_v51 }
 0x1b9   :  { %v60_v55 = vpop.xlane.xlu1 %59  ;;  %v75_v56 = vpop.xlane.xlu0 %74 }
 0x1ba   :  { %vm95_vm9 = vcmp.eq.s32.totalorder %v147_v9, %v49_v52  ;;  %v61_v58 = vcvt.f32.s32 %v60_v55  ;;  %v76_v59 = vcvt.f32.s32 %v75_v56 }
 0x1bb   :  { %v115_v61 = vsel %vm95_vm9, 1.0, %v120_v60 }
 0x1bc   :  { %107 = vst.msk [vmem:[%s178_s1] sm:$0xff] %vm12_vm0, %v115_v61  ;;  %v64_v62 = vadd.s32 %v63_v53, %v61_v58  ;;  %v79_v63 = vadd.s32 %v78_v54, %v76_v59 }
 0x1bd   :  { %v90_v0 = vpop.xlane.xlu1 %89 }
 0x1be   :  { %vm96_vm10 = vcmp.eq.s32.totalorder %v147_v9, %v64_v62  ;;  %vm97_vm11 = vcmp.eq.s32.totalorder %v147_v9, %v79_v63  ;;  %v91_v2 = vcvt.f32.s32 %v90_v0 }
 0x1bf   :  { %v116_v3 = vsel %vm96_vm10, 1.0, %v120_v60  ;;  %v117_v4 = vsel %vm97_vm11, 1.0, %v120_v60 }
 0x1c0   :  { %108 = vst.msk [vmem:[%s178_s1 + $0x8] sm:$0xff] %vm12_vm0, %v116_v3  ;;  %109 = vst.msk [vmem:[%s178_s1 + $0x10] sm:$0xff] %vm12_vm0, %v117_v4  ;;  %v94_v5 = vadd.s32 %v93_v1, %v91_v2 }
 0x1c2   :  { %vm98_vm12 = vcmp.eq.s32.totalorder %v147_v9, %v94_v5 }
 0x1c3   :  { %v118_v6 = vsel %vm98_vm12, 1.0, %v120_v60 }
 0x1c4   :  { %110 = vst.msk [vmem:[%s178_s1 + $0x18] sm:$0xff] %vm12_vm0, %v118_v6 }

</bundles_post_ra>
